<compile_context>
chip_gen: v6e
topology: v6e:2x2x1
jax: 0.10.0
libtpu: 0.0.40
codegen_flags: <defaults>
</compile_context>

<pallas_src>
import functools

import jax
import jax.numpy as jnp
import numpy as np
from jax.experimental import pallas as pl
from jax.experimental.pallas import tpu as pltpu


# ----------------------------------------------------------------------------
# Path A: table resident in VMEM (grid-invariant block), in-kernel row gather.
# ----------------------------------------------------------------------------
def _resident_gather_kernel(ids_ref, table_ref, out_ref, *, tokens_per_step):
    # ids_ref   : SMEM scalar-prefetch ref holding ALL flat token ids.
    # table_ref : (V, D) VMEM-resident embedding table (same block every step).
    # out_ref   : (T, D) VMEM output tile for this grid step.
    base = pl.program_id(0) * tokens_per_step
    for t in range(tokens_per_step):  # small static unroll
        row = ids_ref[base + t]
        out_ref[pl.ds(t, 1), :] = table_ref[pl.ds(row, 1), :]


# ----------------------------------------------------------------------------
# Path B: table stays in HBM; T row DMAs gathered directly into the output
# tile, all in flight at once (paged-attention style manual DMA gather).
# ----------------------------------------------------------------------------
def _dma_gather_kernel(ids_ref, table_hbm, out_ref, sems, *, tokens_per_step):
    base = pl.program_id(0) * tokens_per_step
    # Launch all T row fetches so several 512 B-class DMAs overlap.
    for t in range(tokens_per_step):
        row = ids_ref[base + t]
        pltpu.make_async_copy(
            table_hbm.at[pl.ds(row, 1), :],
            out_ref.at[pl.ds(t, 1), :],
            sems.at[t],
        ).start()
    # Drain (descriptor rebuilt with any same-shape source slice).
    for t in range(tokens_per_step):
        pltpu.make_async_copy(
            table_hbm.at[pl.ds(0, 1), :],
            out_ref.at[pl.ds(t, 1), :],
            sems.at[t],
        ).wait()


def embedding_lookup(
    indices,
    table,
    *,
    tokens_per_step=8,
    vmem_resident_budget_bytes=16 * 1024 * 1024,
):
    """indices: int array (any shape); table: (V, D) -> indices.shape + (D,)."""
    orig_shape = indices.shape
    V, D = table.shape
    n_tok = int(np.prod(orig_shape))
    T = int(tokens_per_step)

    # Clamp ids (PyTorch would raise on OOB; here we avoid an unchecked HBM fetch).
    flat_ids = jnp.clip(indices.reshape(n_tok).astype(jnp.int32), 0, V - 1)

    # Pad token count up to a multiple of T so every grid step is full.
    n_pad = ((n_tok + T - 1) // T) * T
    if n_pad != n_tok:
        flat_ids = jnp.concatenate(
            [flat_ids, jnp.zeros((n_pad - n_tok,), jnp.int32)]
        )
    grid = (n_pad // T,)

    table_bytes = int(V) * int(D) * int(table.dtype.itemsize)
    out_shape = jax.ShapeDtypeStruct((n_pad, D), table.dtype)
    out_spec = pl.BlockSpec((T, D), lambda i, ids: (i, 0))

    if table_bytes <= vmem_resident_budget_bytes:
        # --- VMEM-resident table path (used by the demo shapes). ---
        kernel = functools.partial(
            _resident_gather_kernel, tokens_per_step=T
        )
        grid_spec = pltpu.PrefetchScalarGridSpec(
            num_scalar_prefetch=1,
            grid=grid,
            in_specs=[pl.BlockSpec((V, D), lambda i, ids: (0, 0))],
            out_specs=out_spec,
        )
        # Budget: table (possibly double-buffered) + output blocks + headroom,
        # capped to stay inside v7x's 64 MiB physical VMEM.
        vmem_limit = int(min(2 * table_bytes + (16 << 20), 48 << 20))
        compiler_params = pltpu.CompilerParams(
            dimension_semantics=("parallel",),
            vmem_limit_bytes=vmem_limit,
        )
        scratch_note_args = ()
    else:
        # --- Manual multi-DMA gather path for tables too big for VMEM. ---
        kernel = functools.partial(_dma_gather_kernel, tokens_per_step=T)
        grid_spec = pltpu.PrefetchScalarGridSpec(
            num_scalar_prefetch=1,
            grid=grid,
            in_specs=[pl.BlockSpec(memory_space=pl.ANY)],
            out_specs=out_spec,
            scratch_shapes=[pltpu.SemaphoreType.DMA((T,))],
        )
        compiler_params = pltpu.CompilerParams(
            dimension_semantics=("parallel",),
        )
        scratch_note_args = ()

    out_flat = pl.pallas_call(
        kernel,
        out_shape=out_shape,
        grid_spec=grid_spec,
        compiler_params=compiler_params,
    )(flat_ids, table, *scratch_note_args)

    return out_flat[:n_tok].reshape(*orig_shape, D)


if __name__ == "__main__":
    vocab_size = 64
    embed_dim = 128
    batch = 2
    seq = 8

    key = jax.random.PRNGKey(0)
    k_w, k_idx = jax.random.split(key)

    # torch.nn.Embedding default init: weight ~ N(0, 1), float32.
    # (A bf16 table halves HBM/VMEM bytes and is a drop-in at the call site if
    #  the consumer tolerates bf16; kept f32 here to match nn.Embedding exactly.)
    table = jax.random.normal(k_w, (vocab_size, embed_dim), dtype=jnp.float32)
    indices = jax.random.randint(
        k_idx, (batch, seq), 0, vocab_size, dtype=jnp.int32
    )

    out = embedding_lookup(indices, table)
    out = jax.block_until_ready(out)

    ref = jnp.take(table, indices, axis=0)
    np.testing.assert_allclose(np.asarray(out), np.asarray(ref), rtol=0, atol=0)
    assert out.shape == (batch, seq, embed_dim)

    print("KERNEL_OK")
</pallas_src>

<mosaic_0001>
module attributes {stable_mosaic.version = 11 : i64} {
  func.func @_resident_gather_kernel(%arg0: i32, %arg1: memref<16xi32, #tpu.memory_space<smem>>, %arg2: memref<64x128xf32, #tpu.memory_space<vmem>>, %arg3: memref<8x128xf32, #tpu.memory_space<vmem>>) attributes {dimension_semantics = [#tpu.dimension_semantics<parallel>], iteration_bounds = array<i64: 2>, scalar_prefetch = 1 : i64, scratch_operands = 0 : i64, tpu.core_type = #tpu.core_type<tc>, window_params = [{pipeline_mode = #tpu.pipeline_mode<synchronous>, transform_indices = @transform_0, window_bounds = array<i64: 64, 128>}, {transform_indices = @transform_1, window_bounds = array<i64: 8, 128>}]} {
    %c8_i32 = arith.constant 8 : i32
    %0 = arith.muli %arg0, %c8_i32 : i32
    %c0_i32 = arith.constant 0 : i32
    %1 = arith.addi %0, %c0_i32 : i32
    %2 = arith.index_cast %1 : i32 to index
    %3 = memref.load %arg1[%2] : memref<16xi32, #tpu.memory_space<smem>>
    %4 = arith.index_cast %3 : i32 to index
    %c0 = arith.constant 0 : index
    %5 = vector.load %arg2[%4, %c0] : memref<64x128xf32, #tpu.memory_space<vmem>>, vector<1x128xf32>
    %c0_0 = arith.constant 0 : index
    %c0_1 = arith.constant 0 : index
    %6 = vector.load %arg3[%c0_0, %c0_1] : memref<8x128xf32, #tpu.memory_space<vmem>>, vector<1x128xf32>
    tpu.vector_store %arg3[%c0_0, %c0_1], %5 {strides = array<i32>} : memref<8x128xf32, #tpu.memory_space<vmem>>, vector<1x128xf32>,
    %c1_i32 = arith.constant 1 : i32
    %7 = arith.addi %0, %c1_i32 : i32
    %8 = arith.index_cast %7 : i32 to index
    %9 = memref.load %arg1[%8] : memref<16xi32, #tpu.memory_space<smem>>
    %10 = arith.index_cast %9 : i32 to index
    %c0_2 = arith.constant 0 : index
    %11 = vector.load %arg2[%10, %c0_2] : memref<64x128xf32, #tpu.memory_space<vmem>>, vector<1x128xf32>
    %c1 = arith.constant 1 : index
    %c0_3 = arith.constant 0 : index
    %12 = vector.load %arg3[%c1, %c0_3] : memref<8x128xf32, #tpu.memory_space<vmem>>, vector<1x128xf32>
    tpu.vector_store %arg3[%c1, %c0_3], %11 {strides = array<i32>} : memref<8x128xf32, #tpu.memory_space<vmem>>, vector<1x128xf32>,
    %c2_i32 = arith.constant 2 : i32
    %13 = arith.addi %0, %c2_i32 : i32
    %14 = arith.index_cast %13 : i32 to index
    %15 = memref.load %arg1[%14] : memref<16xi32, #tpu.memory_space<smem>>
    %16 = arith.index_cast %15 : i32 to index
    %c0_4 = arith.constant 0 : index
    %17 = vector.load %arg2[%16, %c0_4] : memref<64x128xf32, #tpu.memory_space<vmem>>, vector<1x128xf32>
    %c2 = arith.constant 2 : index
    %c0_5 = arith.constant 0 : index
    %18 = vector.load %arg3[%c2, %c0_5] : memref<8x128xf32, #tpu.memory_space<vmem>>, vector<1x128xf32>
    tpu.vector_store %arg3[%c2, %c0_5], %17 {strides = array<i32>} : memref<8x128xf32, #tpu.memory_space<vmem>>, vector<1x128xf32>,
    %c3_i32 = arith.constant 3 : i32
    %19 = arith.addi %0, %c3_i32 : i32
    %20 = arith.index_cast %19 : i32 to index
    %21 = memref.load %arg1[%20] : memref<16xi32, #tpu.memory_space<smem>>
    %22 = arith.index_cast %21 : i32 to index
    %c0_6 = arith.constant 0 : index
    %23 = vector.load %arg2[%22, %c0_6] : memref<64x128xf32, #tpu.memory_space<vmem>>, vector<1x128xf32>
    %c3 = arith.constant 3 : index
    %c0_7 = arith.constant 0 : index
    %24 = vector.load %arg3[%c3, %c0_7] : memref<8x128xf32, #tpu.memory_space<vmem>>, vector<1x128xf32>
    tpu.vector_store %arg3[%c3, %c0_7], %23 {strides = array<i32>} : memref<8x128xf32, #tpu.memory_space<vmem>>, vector<1x128xf32>,
    %c4_i32 = arith.constant 4 : i32
    %25 = arith.addi %0, %c4_i32 : i32
    %26 = arith.index_cast %25 : i32 to index
    %27 = memref.load %arg1[%26] : memref<16xi32, #tpu.memory_space<smem>>
    %28 = arith.index_cast %27 : i32 to index
    %c0_8 = arith.constant 0 : index
    %29 = vector.load %arg2[%28, %c0_8] : memref<64x128xf32, #tpu.memory_space<vmem>>, vector<1x128xf32>
    %c4 = arith.constant 4 : index
    %c0_9 = arith.constant 0 : index
    %30 = vector.load %arg3[%c4, %c0_9] : memref<8x128xf32, #tpu.memory_space<vmem>>, vector<1x128xf32>
    tpu.vector_store %arg3[%c4, %c0_9], %29 {strides = array<i32>} : memref<8x128xf32, #tpu.memory_space<vmem>>, vector<1x128xf32>,
    %c5_i32 = arith.constant 5 : i32
    %31 = arith.addi %0, %c5_i32 : i32
    %32 = arith.index_cast %31 : i32 to index
    %33 = memref.load %arg1[%32] : memref<16xi32, #tpu.memory_space<smem>>
    %34 = arith.index_cast %33 : i32 to index
    %c0_10 = arith.constant 0 : index
    %35 = vector.load %arg2[%34, %c0_10] : memref<64x128xf32, #tpu.memory_space<vmem>>, vector<1x128xf32>
    %c5 = arith.constant 5 : index
    %c0_11 = arith.constant 0 : index
    %36 = vector.load %arg3[%c5, %c0_11] : memref<8x128xf32, #tpu.memory_space<vmem>>, vector<1x128xf32>
    tpu.vector_store %arg3[%c5, %c0_11], %35 {strides = array<i32>} : memref<8x128xf32, #tpu.memory_space<vmem>>, vector<1x128xf32>,
    %c6_i32 = arith.constant 6 : i32
    %37 = arith.addi %0, %c6_i32 : i32
    %38 = arith.index_cast %37 : i32 to index
    %39 = memref.load %arg1[%38] : memref<16xi32, #tpu.memory_space<smem>>
    %40 = arith.index_cast %39 : i32 to index
    %c0_12 = arith.constant 0 : index
    %41 = vector.load %arg2[%40, %c0_12] : memref<64x128xf32, #tpu.memory_space<vmem>>, vector<1x128xf32>
    %c6 = arith.constant 6 : index
    %c0_13 = arith.constant 0 : index
    %42 = vector.load %arg3[%c6, %c0_13] : memref<8x128xf32, #tpu.memory_space<vmem>>, vector<1x128xf32>
    tpu.vector_store %arg3[%c6, %c0_13], %41 {strides = array<i32>} : memref<8x128xf32, #tpu.memory_space<vmem>>, vector<1x128xf32>,
    %c7_i32 = arith.constant 7 : i32
    %43 = arith.addi %0, %c7_i32 : i32
    %44 = arith.index_cast %43 : i32 to index
    %45 = memref.load %arg1[%44] : memref<16xi32, #tpu.memory_space<smem>>
    %46 = arith.index_cast %45 : i32 to index
    %c0_14 = arith.constant 0 : index
    %47 = vector.load %arg2[%46, %c0_14] : memref<64x128xf32, #tpu.memory_space<vmem>>, vector<1x128xf32>
    %c7 = arith.constant 7 : index
    %c0_15 = arith.constant 0 : index
    %48 = vector.load %arg3[%c7, %c0_15] : memref<8x128xf32, #tpu.memory_space<vmem>>, vector<1x128xf32>
    tpu.vector_store %arg3[%c7, %c0_15], %47 {strides = array<i32>} : memref<8x128xf32, #tpu.memory_space<vmem>>, vector<1x128xf32>,
    return
  }
  func.func @transform_0(%arg0: i32, %arg1: memref<16xi32, #tpu.memory_space<smem>>) -> (i32, i32) {
    %c0_i32 = arith.constant 0 : i32
    %c0_i32_0 = arith.constant 0 : i32
    %c0_i32_1 = arith.constant 0 : i32
    return %c0_i32, %c0_i32_0 : i32, i32
  }
  func.func @transform_1(%arg0: i32, %arg1: memref<16xi32, #tpu.memory_space<smem>>) -> (i32, i32) {
    %c0_i32 = arith.constant 0 : i32
    %c0_i32_0 = arith.constant 0 : i32
    return %arg0, %c0_i32 : i32, i32
  }
}

</mosaic_0001>

<bundles_post_ra>
// kernel: tpu_custom_call.1
= control target key start
LH: loop header
LB: loop body
LE: loop exit
PB: predicated region body
PF: predicated region fallthrough
CT: control target
= control target key end

     0   :  { %s402_s9 = smov [#allocation3]   ;;  %s542_s0 = inlined_call_operand.hbm [shape: s32[16], index: 0, kind: input, shape index: {}]   ;;  %s543_s1 = inlined_call_operand.hbm [shape: f32[64,128], index: 1, kind: input, shape index: {}]   ;;  %s544_s2 = inlined_call_operand.hbm [shape: f32[16,128], index: 2, kind: output, shape index: {}]  }
   0x1   :  { %546 = sst [smem:[#allocation11_spill]] %s543_s1 }
   0x2   :  { %8 = dma.hbm_to_smem %s542_s0, 16, %s402_s9, [#allocation2] }
   0x3   :  { %376 = dma.done.wait [#allocation2], 16 }
   0x4   :  { %377 = vsyncadd [#allocation2], 4294967280 }
   0x5   :  { %10 = sfence }
   0x6   :  { %11 = vsyncpa [#allocation5], 0 }
   0x7   :  { %12 = vsyncpa [#allocation6], 0 }
   0x8   :  { %14 = vsyncpa [#allocation6 + $0x1], 0  ;;  %s425_s12 = smov 0   ;;  %s427_s13 = smov 0  }
   0x9   :  { %s429_s14 = smov 0   ;;  %s431_s15 = smov 0  }
   0xa LB: > { %s446_s0 = sadd.s32 4294967295, %s400_s15   ;;  %s236_s16 = sadd.s32 4294967294, %s400_s15   ;;  %s400_s15 = sphi %s431_s15, %s556_s15   ;;  %s396_s14 = sphi %s429_s14, %s555_s14   ;;  %s392_s13 = sphi %s427_s13, %s554_s13   ;;  %s388_s12 = sphi %s425_s12, %s553_s12  }
   0xb   : > { %s450_s17 = sadd.s32 1, %s400_s15   ;;  %s48_s18 = sadd.s32 1, %s396_s14 }
   0xc   : > { %s45_s19 = ssub.s32 %s400_s15, %s450_s17  ;;  %p58_p0 = scmp.ne.s32.totalorder %s396_s14, %s392_s13 }
   0xd   : > { %p46_p1 = scmp.eq.s32.totalorder %s45_s19, 0  ;;  %p59_p2 = scmp.eq.s32.totalorder %s446_s0, 1 }
   0xe   : > { %p64_p3 = scmp.ne.s32.totalorder %s392_s13, %s388_s12  ;;  %p65_p4 = scmp.eq.s32.totalorder %s236_s16, 1 }
   0xf   : > { %s461_s20 = scalar_select %p46_p1, %s396_s14, %s48_s18  }
  0x10   : > { %p463_p5 = por %p59_p2, %p58_p0  ;;  %p467_p6 = por %p65_p4, %p64_p3 }
  0x11   : > { %p237_p7 = scmp.ge.s32.totalorder %s400_s15, 1  ;;  %p72_p8 = scmp.lt.s32.totalorder %s400_s15, 3 }
  0x12   : > { %s548_s22 = scalar_select %p467_p6, 1, 0 }
  0x13   : > { %p261_p9 = scmp.eq.s32.totalorder %s446_s0, 0  ;;  %p474_p10 = pnand %p237_p7, %p72_p8 }
  0x14   : > { %s403_s24 = smov [#allocation4]  }
  0x15   : > { %s84_s25 = sshll.u32 %s403_s24, 4  ;;  %p253_p11 = pneg %p474_p10  ;;  %s85_s25 = int_to_ptr.vmem [resolvable:$true] %s84_s25 }
  0x16   : > { %s319_s26 = scalar_lea.vmem %s85_s25, 1024  ;;  %p327_p3 = scmp.lt.s32.totalorder %s85_s25, %s85_s25 }
  0x17   : > { %p254_p12 = pnand %p261_p9, %p253_p11  ;;  %p320_p0 = scmp.ne.s32.totalorder %s85_s25, %s319_s26 }
  0x18   : > { %p328_p4 = scmp.lt.s32.totalorder %s319_s26, %s319_s26 }
  0x19   : > { %p310_p13 = pneg %p254_p12 }
  0x1a   : > { %p329_p6 = por %p328_p4, %p327_p3 }
  0x1b   : > { %p322_p1 = pnand %p320_p0, %p310_p13 }
  0x1d   : > { %p323_p2 = pneg %p322_p1 }
  0x1f   : > { %p330_p7 = pnand %p329_p6, %p323_p2 }
  0x21   : > { %333 = shalt.err (!%p330_p7)
}
  0x22   : > { %s404_s27 = smov 128   ;;  %s405_s28 = smov 8  }
  0x23   : > { %s550_s1 = sld [smem:[#allocation11_spill]] }
  0x25   : > { %100 = sbr.rel (%p474_p10) target bundleno = 81 (0x51), region = 24 }
  0x29   : > { %256 = dma.hbm_to_vmem [thread:$0]  (!%p254_p12), %s550_s1, 1024, %s85_s25, [#allocation5], %s404_s27, %s404_s27, %s405_s28  }
  0x2a   : > { %379 = dma.done.wait (%p261_p9), [#allocation5], 1024  }
  0x2b   : > { %381 = vsyncadd (%p261_p9), [#allocation5], 4294966272  ;;  %s545_s3 = sand.u32 1, %s392_s13   ;;  %s242_s4 = sshll.u32 %s446_s0, 3 }
  0x2c   : > { %s241_s5 = sshll.u32 %s545_s3, 3  ;;  %s116_s6 = sld [smem:[#allocation3 + %s242_s4]] }
  0x2d   : > { %s120_s7 = sadd.s32 1, %s242_s4  ;;  %s125_s8 = sadd.s32 2, %s242_s4 }
  0x2e   : > { %s121_s9 = sld [smem:[#allocation3 + %s120_s7]]  ;;  %s130_s10 = sadd.s32 3, %s242_s4 }
  0x2f   : > { %s126_s11 = sld [smem:[#allocation3 + %s125_s8]]  ;;  %s135_s16 = sadd.s32 4, %s242_s4 }
  0x30   : > { %s131_s18 = sld [smem:[#allocation3 + %s130_s10]]  ;;  %s140_s19 = sadd.s32 5, %s242_s4 }
  0x31   : > { %s136_s23 = sld [smem:[#allocation3 + %s135_s16]]  ;;  %s145_s26 = sadd.s32 6, %s242_s4 }
  0x32   : > { %s117_s24 = scalar_lea.vmem [#allocation4], %s116_s6  ;;  %s141_s25 = sld [smem:[#allocation3 + %s140_s19]] }
  0x33   : > { %v118_v0 = vld [vmem:[%s117_s24] sm:$0x1]  ;;  %s114_s27 = scalar_lea.vmem [#allocation7], %s241_s5  ;;  %s146_s28 = sld [smem:[#allocation3 + %s145_s26]] }
  0x34   : > { %119 = vst [vmem:[%s114_s27] sm:$0x1] %v118_v0  ;;  %s150_s29 = sadd.s32 7, %s242_s4  ;;  %s122_s3 = scalar_lea.vmem [#allocation4], %s121_s9 }
  0x35   : > { %s151_s30 = sld [smem:[#allocation3 + %s150_s29]]  ;;  %v123_v1 = vld [vmem:[%s122_s3] sm:$0x1]  ;;  %s127_s7 = scalar_lea.vmem [#allocation4], %s126_s11 }
  0x36   : > { %124 = vst [vmem:[%s114_s27 + $0x1] sm:$0x1] %v123_v1  ;;  %v128_v2 = vld [vmem:[%s127_s7] sm:$0x1]  ;;  %s244_s8 = sshll.u32 %s446_s0, 7  ;;  %s132_s10 = scalar_lea.vmem [#allocation4], %s131_s18 }
  0x37   : > { %129 = vst [vmem:[%s114_s27 + $0x2] sm:$0x1] %v128_v2  ;;  %v133_v3 = vld [vmem:[%s132_s10] sm:$0x1]  ;;  %s169_s1 = sshll.u32 %s114_s27, 4  ;;  %s137_s6 = scalar_lea.vmem [#allocation4], %s136_s23  ;;  %s501_s1 = int_to_ptr.vmem [resolvable:$true] %s169_s1 }
  0x38   : > { %134 = vst [vmem:[%s114_s27 + $0x3] sm:$0x1] %v133_v3  ;;  %v138_v4 = vld [vmem:[%s137_s6] sm:$0x1]  ;;  %s142_s5 = scalar_lea.vmem [#allocation4], %s141_s25  ;;  %s499_s3 = scalar_lea.hbm %s544_s2, %s244_s8 }
  0x39   : > { %139 = vst [vmem:[%s114_s27 + $0x4] sm:$0x1] %v138_v4  ;;  %v143_v5 = vld [vmem:[%s142_s5] sm:$0x1]  ;;  %s147_s9 = scalar_lea.vmem [#allocation4], %s146_s28  ;;  %s551_s11 = sand.u32 1, %s392_s13  }
  0x3a   : > { %144 = vst [vmem:[%s114_s27 + $0x5] sm:$0x1] %v143_v5  ;;  %v148_v6 = vld [vmem:[%s147_s9] sm:$0x1]  ;;  %s156_s18 = scalar_lea.sflag [#allocation6], %s551_s11  ;;  %s334_s19 = scalar_lea.vmem %s501_s1, 128 }
  0x3b   : > { %149 = vst [vmem:[%s114_s27 + $0x6] sm:$0x1] %v148_v6  ;;  %s152_s0 = scalar_lea.vmem [#allocation4], %s151_s30  ;;  %p335_p6 = scmp.ne.s32.totalorder %s501_s1, %s334_s19 }
  0x3c   : > { %v153_v7 = vld [vmem:[%s152_s0] sm:$0x1]  ;;  %s406_s23 = smov [#allocation7]  }
  0x3d   : > { %154 = vst [vmem:[%s114_s27 + $0x7] sm:$0x1] %v153_v7  ;;  %p336_p8 = pnand %p335_p6, %p463_p5  ;;  %s338_s24 = sshll.u32 %s406_s23, 4  ;;  %s339_s24 = int_to_ptr.vmem [resolvable:$false] %s338_s24 }
  0x3e   : > { %s340_s25 = scalar_lea.vmem %s339_s24, 256  ;;  %p341_p10 = scmp.lt.s32.totalorder %s501_s1, %s339_s24 }
  0x3f   : > { %p337_p9 = pneg %p336_p8  ;;  %p342_p11 = scmp.lt.s32.totalorder %s340_s25, %s334_s19 }
  0x41   : > { %p343_p12 = por %p342_p11, %p341_p10 }
  0x43   : > { %p344_p13 = pnand %p343_p12, %p337_p9 }
  0x45   : > { %347 = shalt.err (!%p344_p13)
}
  0x46   : > { %s348_s26 = scalar_lea.hbm %s499_s3, 128  ;;  %s352_s29 = scalar_lea.hbm %s544_s2, 256 }
  0x47   : > { %p349_p0 = scmp.ne.s32.totalorder %s499_s3, %s348_s26  ;;  %p353_p3 = scmp.lt.s32.totalorder %s499_s3, %s544_s2 }
  0x48   : > { %p354_p4 = scmp.lt.s32.totalorder %s352_s29, %s348_s26 }
  0x49   : > { %p350_p1 = pnand %p349_p0, %p463_p5 }
  0x4a   : > { %p355_p7 = por %p354_p4, %p353_p3 }
  0x4b   : > { %p351_p2 = pneg %p350_p1 }
  0x4d   : > { %p356_p6 = pnand %p355_p7, %p351_p2 }
  0x4f   : > { %359 = shalt.err (!%p356_p6)
}
  0x50   : > { %251 = dma.vmem_to_hbm [thread:$0]  (%p463_p5), %s501_s1, 128, %s499_s3, %s156_s18  }
  0x51 PF: > { %p263_p8 = scmp.ge.s32.totalorder %s400_s15, 2  ;;  %s181_s8 = sand.u32 1, %s388_s12  }
  0x52   : > { %p552_p9 = scmp.ne.s32.totalorder %s548_s22, 0  ;;  %s182_s10 = scalar_lea.sflag [#allocation6], %s181_s8 }
  0x54   : > { %p258_p10 = pnand %p263_p8, %p552_p9 }
  0x56   : > { %p259_p11 = pneg %p258_p10 }
  0x58   : > { %383 = dma.done.wait (%p259_p11), %s182_s10, 128  }
  0x59   : > { %385 = vsyncadd (%p259_p11), %s182_s10, 4294967168  ;;  %p17_p12 = scmp.ge.s32.totalorder %s450_s17, 4   ;;  %s553_s12 = smov %s392_s13 }
  0x5a   : > { %s554_s13 = smov %s396_s14  ;;  %s555_s14 = smov %s461_s20 }
  0x5b   : > { %s556_s15 = smov %s450_s17  ;;  %19 = sbr.rel (!%p17_p12) target bundleno = 10 (0xa), region = 69 }
  0x60   :  { %187 = vsyncpa [#allocation5], 1 }
  0x61   :  { %189 = vsyncpa [#allocation5 + $0x1], 1 }
  0x62   :  { %190 = vsyncpa [#allocation6], 1 }
  0x63   :  { %192 = vsyncpa [#allocation6 + $0x1], 1 }

</bundles_post_ra>
